<compile_context>
chip_gen: v5e
topology: v5e:2x2
jax: 0.10.0
libtpu: 0.0.40
codegen_flags: <defaults>
</compile_context>

<pallas_src>
import functools

import jax
import jax.numpy as jnp
from jax.experimental import pallas as pl
from jax.experimental.pallas import tpu as pltpu


def _toeplitz_weights(w, w_in, w_out, p):
    """Expand HWIO conv weights into a flattened block-Toeplitz matmul weight.

    T[kh*W_in*Ci + wi*Ci + ci, wo*Co + co] = w[kh, wi - wo + p, ci, co]
    (zero when the tap falls outside [0, KW)), so a tap-stacked activation slab
    (rows, KH*W_in*Ci) times T performs the conv -- including the W zero
    padding -- as a single lane-dense MXU matmul.
    """
    KH, KW, Ci, Co = w.shape
    T = jnp.zeros((KH, w_in * Ci, w_out * Co), w.dtype)
    for wo in range(w_out):
        for kw in range(KW):
            wi = wo + kw - p
            if 0 <= wi < w_in:
                T = T.at[:, wi * Ci:(wi + 1) * Ci,
                         wo * Co:(wo + 1) * Co].set(w[:, kw])
    return T.reshape(KH * w_in * Ci, w_out * Co)


def _stack_taps(dst_ref, src, KH, R):
    """im2row along H: dst[:, kh*W:(kh+1)*W] = src[kh:kh+R, :] for each tap."""
    width = src.shape[1]
    for kh in range(KH):
        dst_ref[:, kh * width:(kh + 1) * width] = src[kh:kh + R, :]


def _conv1_stats_kernel(x_ref, w_ref, b_ref, y_ref, s_ref, lhs_ref,
                        *, KH, S, H1, pad):
    """conv1 + bias for NB row-stacked images as ONE bf16 MXU matmul
    (K = KH*W*Cin), plus per-step partial BatchNorm statistics."""
    rows = x_ref.shape[0]                       # NB * (H + 2p)
    W1C = y_ref.shape[1]
    R = rows - (KH - 1)

    # Tap-stack the H-padded input slab into the scratch, then a single matmul
    # against the flattened block-Toeplitz weights.
    _stack_taps(lhs_ref, x_ref[...], KH, R)
    y = jnp.dot(lhs_ref[...], w_ref[...],
                preferred_element_type=jnp.float32) + b_ref[...]   # (R, W1C)

    # Partial BN statistics over valid rows only (rows between stacked images
    # are junk and masked out); one stacked (2, W1C) store.
    idx = jax.lax.broadcasted_iota(jnp.int32, (R, W1C), 0)
    ym = jnp.where((idx % S) < H1, y, 0.0)
    s_ref[...] = jnp.concatenate(
        [jnp.sum(ym, axis=0, keepdims=True),
         jnp.sum(ym * ym, axis=0, keepdims=True)], axis=0)

    # y1 goes out bf16 in a pre-padded stacked layout: `pad` zero rows on top,
    # the R matmul rows, then KH-1 zero rows, so kernel 2 needs no in-kernel
    # padding concat.  (Stats come from the f32 values while BN is later applied
    # to the bf16-rounded y1 -- small mismatch covered by the test tolerance.)
    y_ref[pad:pad + R, :] = y.astype(y_ref.dtype)
    if pad > 0:
        y_ref[0:pad, :] = jnp.zeros((pad, W1C), y_ref.dtype)
    if KH > 1:
        y_ref[pad + R:, :] = jnp.zeros((KH - 1, W1C), y_ref.dtype)


def _bn_conv2_pool_kernel(y_ref, scale_ref, shift_ref, w_ref, b_ref, o_ref,
                          lhs_ref, *, KH, S, H1, pad):
    """BN affine + ReLU + conv1_1 + bias + ReLU + 2x1 H-max-pool for NB
    row-stacked images; the second conv is again a single bf16 MXU matmul."""
    rows, W1C = y_ref.shape                     # rows = pad + NB*(H+2p)
    W2C = o_ref.shape[1]
    R = rows - (KH - 1)

    # BN + ReLU in f32.  Rows outside each image's H1 valid rows (the stacked
    # layout's pad/junk rows) are forced to zero so they act as the conv's H
    # zero-padding.  Single hoisted bf16 cast.
    v = y_ref[...].astype(jnp.float32) * scale_ref[...] + shift_ref[...]
    idx = jax.lax.broadcasted_iota(jnp.int32, (rows, W1C), 0)
    valid = ((idx + (S - pad)) % S) < H1
    a = jnp.where(valid, jnp.maximum(v, 0.0), 0.0).astype(jnp.bfloat16)

    _stack_taps(lhs_ref, a, KH, R)
    z = jnp.maximum(
        jnp.dot(lhs_ref[...], w_ref[...],
                preferred_element_type=jnp.float32) + b_ref[...], 0.0)  # (R,W2C)

    # 2x stride-2 max pool along H only; the W pool runs in the wrapper so the
    # store stays lane-dense at W2*Cout lanes.  Image n's valid conv rows start
    # at n*S (S even), so global even/odd pairing pools each image correctly.
    Rp = 2 * (R // 2)
    zp = jnp.max(z[:Rp, :].reshape(Rp // 2, 2, W2C), axis=1)
    o_ref[0:Rp // 2, :] = zp.astype(o_ref.dtype)
    if Rp // 2 < o_ref.shape[0]:
        o_ref[Rp // 2:, :] = jnp.zeros((o_ref.shape[0] - Rp // 2, W2C),
                                       o_ref.dtype)


def conv_block_forward(x_nchw, params, padding=1, eps=1e-5, batch_block=None):
    p = padding
    x = jnp.transpose(x_nchw, (0, 2, 3, 1)).astype(jnp.float32)   # NCHW -> NHWC
    N, H, W, Cin = x.shape
    w1, b1 = params["w1"], params["b1"]
    w2, b2 = params["w2"], params["b2"]
    gamma, beta = params["gamma"], params["beta"]
    KH, KW, _, Cout = w1.shape

    H1, W1 = H + 2 * p - KH + 1, W + 2 * p - KW + 1       # after conv1
    H2, W2 = H1 + 2 * p - KH + 1, W1 + 2 * p - KW + 1     # after conv1_1
    Ho, Wo = H2 // 2, W2 // 2                             # after 2x2 pool
    S = H + 2 * p                                         # per-image row slot
    # TODO(synk): the stacked-slot reuse below assumes KH-1 >= padding and an
    # even slot height; fall back to per-image padding otherwise.
    assert KH - 1 >= p and S % 2 == 0

    # Images per grid step: fill the MXU M-dimension (~256 rows) and amortize
    # the per-grid-step overhead; must divide N.
    if batch_block is None:
        batch_block = min(N, max(1, 256 // S))
        while N % batch_block:
            batch_block -= 1
    NB = batch_block
    G = N // NB

    W1C, W2C = W1 * Cout, W2 * Cout
    Ry = p + NB * S                      # rows of the pre-padded stacked y1 slab
    R1 = NB * S - (KH - 1)               # conv1 matmul rows per step
    R2 = Ry - (KH - 1)                   # conv2 matmul rows per step

    # Lane-dense layout: channels flattened into lanes, H padded, NB images
    # row-stacked per grid step.  W padding is folded into the Toeplitz weights.
    xh = jnp.pad(x, ((0, 0), (p, p), (0, 0), (0, 0)))
    xh = xh.reshape(G, NB * S, W * Cin).astype(jnp.bfloat16)

    w1f = _toeplitz_weights(w1, W, W1, p).astype(jnp.bfloat16)    # (KH*W*Cin, W1C)
    w2f = _toeplitz_weights(w2, W1, W2, p).astype(jnp.bfloat16)   # (KH*W1C,  W2C)
    b1t = jnp.tile(b1, (W1,)).reshape(1, W1C).astype(jnp.float32)
    b2t = jnp.tile(b2, (W2,)).reshape(1, W2C).astype(jnp.float32)

    # TODO(synk): at production H/W/C add H-row tiling with a (KH-1)-row halo,
    # pick NB so each v7x TensorCore gets >=2 grid steps, and set per-generation
    # vmem_limit_bytes (16/32/32 MiB default scoped VMEM on v5e/v6e/v7x).

    # Kernel 1: conv1 + bias (single K=KH*W*Cin matmul) + partial BN stats.
    y1, stats = pl.pallas_call(
        functools.partial(_conv1_stats_kernel, KH=KH, S=S, H1=H1, pad=p),
        out_shape=(jax.ShapeDtypeStruct((G, Ry, W1C), jnp.bfloat16),
                   jax.ShapeDtypeStruct((G, 2, W1C), jnp.float32)),
        grid=(G,),
        in_specs=[
            pl.BlockSpec((None, NB * S, W * Cin), lambda g: (g, 0, 0)),
            pl.BlockSpec((KH * W * Cin, W1C), lambda g: (0, 0)),
            pl.BlockSpec((1, W1C), lambda g: (0, 0)),
        ],
        out_specs=(
            pl.BlockSpec((None, Ry, W1C), lambda g: (g, 0, 0)),
            pl.BlockSpec((None, 2, W1C), lambda g: (g, 0, 0)),
        ),
        scratch_shapes=[pltpu.VMEM((R1, KH * W * Cin), jnp.bfloat16)],
        compiler_params=pltpu.CompilerParams(dimension_semantics=("parallel",)),
    )(xh, w1f, b1t)

    # Training-mode BatchNorm2d statistics (biased variance over N*H1*W1),
    # folded into per-channel scale/shift tiled to the lane-dense layout.
    # TODO(synk): E[x^2]-E[x]^2 in f32 (clamped >= 0); switch to a two-pass
    # variance if activation means grow large.
    cnt = float(N * H1 * W1)
    s = jnp.sum(stats, axis=0).reshape(2, W1, Cout).sum(axis=1)   # (2, Cout)
    mean = s[0] / cnt
    var = jnp.maximum(s[1] / cnt - mean * mean, 0.0)
    inv = gamma * jax.lax.rsqrt(var + eps)
    scale = jnp.tile(inv, (W1,)).reshape(1, W1C).astype(jnp.float32)
    shift = jnp.tile(beta - mean * inv, (W1,)).reshape(1, W1C).astype(jnp.float32)

    # Kernel 2: BN + ReLU + conv1_1 (single K=KH*W1C matmul) + ReLU + H-pool.
    pooled = pl.pallas_call(
        functools.partial(_bn_conv2_pool_kernel, KH=KH, S=S, H1=H1, pad=p),
        out_shape=jax.ShapeDtypeStruct((G, NB * (S // 2), W2C), jnp.float32),
        grid=(G,),
        in_specs=[
            pl.BlockSpec((None, Ry, W1C), lambda g: (g, 0, 0)),
            pl.BlockSpec((1, W1C), lambda g: (0, 0)),
            pl.BlockSpec((1, W1C), lambda g: (0, 0)),
            pl.BlockSpec((KH * W1C, W2C), lambda g: (0, 0)),
            pl.BlockSpec((1, W2C), lambda g: (0, 0)),
        ],
        out_specs=pl.BlockSpec((None, NB * (S // 2), W2C), lambda g: (g, 0, 0)),
        scratch_shapes=[pltpu.VMEM((R2, KH * W1C), jnp.bfloat16)],
        compiler_params=pltpu.CompilerParams(dimension_semantics=("parallel",)),
    )(y1, scale, shift, w2f, b2t)

    # Extract each image's valid H-pooled rows and do the tiny W pool here so
    # the in-kernel stores stay lane-dense (128 lanes).
    ph = pooled.reshape(G, NB, S // 2, W2, Cout)[:, :, :Ho]
    ph = ph.reshape(N, Ho, W2, Cout)
    out = jnp.max(ph[:, :, :2 * Wo].reshape(N, Ho, Wo, 2, Cout), axis=3)
    return jnp.transpose(out, (0, 3, 1, 2))               # back to NCHW


def _ref_forward(x_nchw, params, padding=1, eps=1e-5):
    """Pure-JAX f32 reference (same semantics as the PyTorch module in train mode)."""
    x = jnp.transpose(x_nchw, (0, 2, 3, 1)).astype(jnp.float32)
    dn = ("NHWC", "HWIO", "NHWC")
    y = jax.lax.conv_general_dilated(x, params["w1"], (1, 1),
                                     [(padding, padding)] * 2,
                                     dimension_numbers=dn) + params["b1"]
    mean = jnp.mean(y, axis=(0, 1, 2))
    var = jnp.mean(jnp.square(y - mean), axis=(0, 1, 2))
    y = (y - mean) / jnp.sqrt(var + eps) * params["gamma"] + params["beta"]
    y = jnp.maximum(y, 0.0)
    z = jax.lax.conv_general_dilated(y, params["w2"], (1, 1),
                                     [(padding, padding)] * 2,
                                     dimension_numbers=dn) + params["b2"]
    z = jnp.maximum(z, 0.0)
    z = jax.lax.reduce_window(z, -jnp.inf, jax.lax.max,
                              (1, 2, 2, 1), (1, 2, 2, 1), "VALID")
    return jnp.transpose(z, (0, 3, 1, 2))


if __name__ == "__main__":
    key = jax.random.PRNGKey(0)
    N, Cin, Cout, H, W, K, P = 2, 4, 8, 16, 16, 3, 1
    kx, k1, k2, k3, k4 = jax.random.split(key, 5)

    # Deterministic init mirroring PyTorch's fan-in uniform for the convs.
    bound1 = 1.0 / (Cin * K * K) ** 0.5
    bound2 = 1.0 / (Cout * K * K) ** 0.5
    params = {
        "w1": jax.random.uniform(k1, (K, K, Cin, Cout), jnp.float32, -bound1, bound1),
        "b1": jax.random.uniform(k2, (Cout,), jnp.float32, -bound1, bound1),
        "w2": jax.random.uniform(k3, (K, K, Cout, Cout), jnp.float32, -bound2, bound2),
        "b2": jax.random.uniform(k4, (Cout,), jnp.float32, -bound2, bound2),
        # BatchNorm2d defaults: weight=1, bias=0.
        # Note: bn_conv1_1 exists in the PyTorch __init__ but is unused in forward().
        "gamma": jnp.ones((Cout,), jnp.float32),
        "beta": jnp.zeros((Cout,), jnp.float32),
    }
    x = jax.random.normal(kx, (N, Cin, H, W), jnp.float32)

    out = jax.block_until_ready(conv_block_forward(x, params, padding=P))
    ref = _ref_forward(x, params, padding=P)
    assert out.shape == (N, Cout, H // 2, W // 2), out.shape

    import numpy as np
    # Tolerance reflects bf16 matmul inputs and the bf16 y1 intermediate
    # (accumulation stays f32); the reference is pure f32.
    np.testing.assert_allclose(np.asarray(out), np.asarray(ref),
                               rtol=3e-2, atol=3e-2)
    print("KERNEL_OK")
</pallas_src>

<mosaic_0001>
module attributes {stable_mosaic.version = 11 : i64} {
  func.func @_conv1_stats_kernel(%arg0: i32, %arg1: memref<1x36x64xbf16, #tpu.memory_space<vmem>>, %arg2: memref<192x128xbf16, #tpu.memory_space<vmem>>, %arg3: memref<1x128xf32, #tpu.memory_space<vmem>>, %arg4: memref<1x37x128xbf16, #tpu.memory_space<vmem>>, %arg5: memref<1x2x128xf32, #tpu.memory_space<vmem>>, %arg6: memref<34x192xbf16, #tpu.memory_space<vmem>>) attributes {dimension_semantics = [#tpu.dimension_semantics<parallel>], iteration_bounds = array<i64: 1>, scalar_prefetch = 0 : i64, scratch_operands = 1 : i64, tpu.core_type = #tpu.core_type<tc>, window_params = [{transform_indices = @transform_0, window_bounds = array<i64: 1, 36, 64>}, {pipeline_mode = #tpu.pipeline_mode<synchronous>, transform_indices = @transform_1, window_bounds = array<i64: 192, 128>}, {pipeline_mode = #tpu.pipeline_mode<synchronous>, transform_indices = @transform_2, window_bounds = array<i64: 1, 128>}, {transform_indices = @transform_3, window_bounds = array<i64: 1, 37, 128>}, {transform_indices = @transform_4, window_bounds = array<i64: 1, 2, 128>}]} {
    %c0 = arith.constant 0 : index
    %c0_0 = arith.constant 0 : index
    %c0_1 = arith.constant 0 : index
    %0 = vector.load %arg1[%c0, %c0_0, %c0_1] : memref<1x36x64xbf16, #tpu.memory_space<vmem>>, vector<1x36x64xbf16>
    %1 = vector.shape_cast %0 : vector<1x36x64xbf16> to vector<36x64xbf16>
    %2 = vector.extract_strided_slice %1 {offsets = [0, 0], sizes = [34, 64], strides = [1, 1]} : vector<36x64xbf16> to vector<34x64xbf16>
    %c0_2 = arith.constant 0 : index
    %c0_3 = arith.constant 0 : index
    %3 = vector.load %arg6[%c0_2, %c0_3] : memref<34x192xbf16, #tpu.memory_space<vmem>>, vector<34x64xbf16>
    tpu.vector_store %arg6[%c0_2, %c0_3], %2 {strides = array<i32>} : memref<34x192xbf16, #tpu.memory_space<vmem>>, vector<34x64xbf16>,
    %4 = vector.extract_strided_slice %1 {offsets = [1, 0], sizes = [34, 64], strides = [1, 1]} : vector<36x64xbf16> to vector<34x64xbf16>
    %c0_4 = arith.constant 0 : index
    %c64 = arith.constant 64 : index
    %5 = vector.load %arg6[%c0_4, %c64] : memref<34x192xbf16, #tpu.memory_space<vmem>>, vector<34x64xbf16>
    tpu.vector_store %arg6[%c0_4, %c64], %4 {strides = array<i32>} : memref<34x192xbf16, #tpu.memory_space<vmem>>, vector<34x64xbf16>,
    %6 = vector.extract_strided_slice %1 {offsets = [2, 0], sizes = [34, 64], strides = [1, 1]} : vector<36x64xbf16> to vector<34x64xbf16>
    %c0_5 = arith.constant 0 : index
    %c128 = arith.constant 128 : index
    %7 = vector.load %arg6[%c0_5, %c128] : memref<34x192xbf16, #tpu.memory_space<vmem>>, vector<34x64xbf16>
    tpu.vector_store %arg6[%c0_5, %c128], %6 {strides = array<i32>} : memref<34x192xbf16, #tpu.memory_space<vmem>>, vector<34x64xbf16>,
    %c0_6 = arith.constant 0 : index
    %c0_7 = arith.constant 0 : index
    %8 = vector.load %arg6[%c0_6, %c0_7] : memref<34x192xbf16, #tpu.memory_space<vmem>>, vector<34x192xbf16>
    %c0_8 = arith.constant 0 : index
    %c0_9 = arith.constant 0 : index
    %9 = vector.load %arg2[%c0_8, %c0_9] : memref<192x128xbf16, #tpu.memory_space<vmem>>, vector<192x128xbf16>
    %cst = arith.constant dense<0.000000e+00> : vector<34x128xf32>
    %10 = tpu.matmul %8, %9, %cst {dimension_numbers = #tpu.dot_dimension_numbers<[1], [0], [0], [1], [0, 0, 1, 1], [], []>} : vector<34x192xbf16>, vector<192x128xbf16>, vector<34x128xf32> -> vector<34x128xf32>
    %c0_10 = arith.constant 0 : index
    %c0_11 = arith.constant 0 : index
    %11 = vector.load %arg3[%c0_10, %c0_11] : memref<1x128xf32, #tpu.memory_space<vmem>>, vector<1x128xf32>
    %12 = vector.broadcast %11 : vector<1x128xf32> to vector<34x128xf32>
    %13 = arith.addf %10, %12 : vector<34x128xf32>
    %14 = tpu.iota {dimensions = array<i32: 0>} : vector<34x128xi32>
    %c18_i32 = arith.constant 18 : i32
    %c0_i32 = arith.constant 0 : i32
    %15 = arith.cmpi eq, %c18_i32, %c0_i32 : i32
    %c1_i32 = arith.constant 1 : i32
    %16 = arith.select %15, %c1_i32, %c18_i32 : i32
    %17 = vector.broadcast %16 : i32 to vector<34x128xi32>
    %18 = arith.remsi %14, %17 : vector<34x128xi32>
    %c0_i32_12 = arith.constant 0 : i32
    %19 = vector.broadcast %c0_i32_12 : i32 to vector<34x128xi32>
    %20 = arith.cmpi ne, %18, %19 : vector<34x128xi32>
    %c0_i32_13 = arith.constant 0 : i32
    %21 = vector.broadcast %c0_i32_13 : i32 to vector<34x128xi32>
    %22 = arith.cmpi slt, %18, %21 : vector<34x128xi32>
    %c0_i32_14 = arith.constant 0 : i32
    %23 = arith.cmpi slt, %16, %c0_i32_14 : i32
    %24 = vector.broadcast %23 : i1 to vector<34x128xi1>
    %25 = vector.broadcast %24 : vector<34x128xi1> to vector<34x128xi1>
    %26 = arith.xori %22, %25 : vector<34x128xi1>
    %27 = arith.andi %26, %20 : vector<34x128xi1>
    %28 = vector.broadcast %16 : i32 to vector<34x128xi32>
    %29 = arith.addi %18, %28 : vector<34x128xi32>
    %30 = arith.select %27, %29, %18 : vector<34x128xi1>, vector<34x128xi32>
    %c16_i32 = arith.constant 16 : i32
    %31 = vector.broadcast %c16_i32 : i32 to vector<34x128xi32>
    %32 = arith.cmpi slt, %30, %31 : vector<34x128xi32>
    %cst_15 = arith.constant 0.000000e+00 : f32
    %33 = vector.broadcast %cst_15 : f32 to vector<34x128xf32>
    %34 = arith.select %32, %13, %33 : vector<34x128xi1>, vector<34x128xf32>
    %cst_16 = arith.constant dense<0.000000e+00> : vector<128xf32>
    %35 = vector.multi_reduction <add>, %34, %cst_16 [0] : vector<34x128xf32> to vector<128xf32>
    %36 = vector.shape_cast %35 : vector<128xf32> to vector<1x128xf32>
    %37 = arith.mulf %34, %34 : vector<34x128xf32>
    %cst_17 = arith.constant dense<0.000000e+00> : vector<128xf32>
    %38 = vector.multi_reduction <add>, %37, %cst_17 [0] : vector<34x128xf32> to vector<128xf32>
    %39 = vector.shape_cast %38 : vector<128xf32> to vector<1x128xf32>
    %40 = tpu.concatenate %36, %39 in 0 : vector<1x128xf32>, vector<1x128xf32> -> vector<2x128xf32>
    %c0_18 = arith.constant 0 : index
    %c0_19 = arith.constant 0 : index
    %c0_20 = arith.constant 0 : index
    %41 = vector.load %arg5[%c0_18, %c0_19, %c0_20] : memref<1x2x128xf32, #tpu.memory_space<vmem>>, vector<1x2x128xf32>
    %42 = vector.shape_cast %41 : vector<1x2x128xf32> to vector<2x128xf32>
    %43 = vector.shape_cast %40 : vector<2x128xf32> to vector<1x2x128xf32>
    tpu.vector_store %arg5[%c0_18, %c0_19, %c0_20], %43 {strides = array<i32>} : memref<1x2x128xf32, #tpu.memory_space<vmem>>, vector<1x2x128xf32>,
    %44 = arith.truncf %13 : vector<34x128xf32> to vector<34x128xbf16>
    %c0_21 = arith.constant 0 : index
    %c1 = arith.constant 1 : index
    %c0_22 = arith.constant 0 : index
    %45 = vector.load %arg4[%c0_21, %c1, %c0_22] : memref<1x37x128xbf16, #tpu.memory_space<vmem>>, vector<1x34x128xbf16>
    %46 = vector.shape_cast %45 : vector<1x34x128xbf16> to vector<34x128xbf16>
    %47 = vector.shape_cast %44 : vector<34x128xbf16> to vector<1x34x128xbf16>
    tpu.vector_store %arg4[%c0_21, %c1, %c0_22], %47 {strides = array<i32>} : memref<1x37x128xbf16, #tpu.memory_space<vmem>>, vector<1x34x128xbf16>,
    %cst_23 = arith.constant 0.000000e+00 : bf16
    %48 = vector.broadcast %cst_23 : bf16 to vector<1x128xbf16>
    %c0_24 = arith.constant 0 : index
    %c0_25 = arith.constant 0 : index
    %c0_26 = arith.constant 0 : index
    %49 = vector.load %arg4[%c0_24, %c0_25, %c0_26] : memref<1x37x128xbf16, #tpu.memory_space<vmem>>, vector<1x1x128xbf16>
    %50 = vector.shape_cast %49 : vector<1x1x128xbf16> to vector<1x128xbf16>
    %51 = vector.shape_cast %48 : vector<1x128xbf16> to vector<1x1x128xbf16>
    tpu.vector_store %arg4[%c0_24, %c0_25, %c0_26], %51 {strides = array<i32>} : memref<1x37x128xbf16, #tpu.memory_space<vmem>>, vector<1x1x128xbf16>,
    %cst_27 = arith.constant 0.000000e+00 : bf16
    %52 = vector.broadcast %cst_27 : bf16 to vector<2x128xbf16>
    %c0_28 = arith.constant 0 : index
    %c35 = arith.constant 35 : index
    %c0_29 = arith.constant 0 : index
    %53 = vector.load %arg4[%c0_28, %c35, %c0_29] : memref<1x37x128xbf16, #tpu.memory_space<vmem>>, vector<1x2x128xbf16>
    %54 = vector.shape_cast %53 : vector<1x2x128xbf16> to vector<2x128xbf16>
    %55 = vector.shape_cast %52 : vector<2x128xbf16> to vector<1x2x128xbf16>
    tpu.vector_store %arg4[%c0_28, %c35, %c0_29], %55 {strides = array<i32>} : memref<1x37x128xbf16, #tpu.memory_space<vmem>>, vector<1x2x128xbf16>,
    return
  }
  func.func @transform_0(%arg0: i32) -> (i32, i32, i32) {
    %c0_i32 = arith.constant 0 : i32
    %c0_i32_0 = arith.constant 0 : i32
    %c0_i32_1 = arith.constant 0 : i32
    return %arg0, %c0_i32, %c0_i32_0 : i32, i32, i32
  }
  func.func @transform_1(%arg0: i32) -> (i32, i32) {
    %c0_i32 = arith.constant 0 : i32
    %c0_i32_0 = arith.constant 0 : i32
    %c0_i32_1 = arith.constant 0 : i32
    return %c0_i32, %c0_i32_0 : i32, i32
  }
  func.func @transform_2(%arg0: i32) -> (i32, i32) {
    %c0_i32 = arith.constant 0 : i32
    %c0_i32_0 = arith.constant 0 : i32
    %c0_i32_1 = arith.constant 0 : i32
    return %c0_i32, %c0_i32_0 : i32, i32
  }
  func.func @transform_3(%arg0: i32) -> (i32, i32, i32) {
    %c0_i32 = arith.constant 0 : i32
    %c0_i32_0 = arith.constant 0 : i32
    %c0_i32_1 = arith.constant 0 : i32
    return %arg0, %c0_i32, %c0_i32_0 : i32, i32, i32
  }
  func.func @transform_4(%arg0: i32) -> (i32, i32, i32) {
    %c0_i32 = arith.constant 0 : i32
    %c0_i32_0 = arith.constant 0 : i32
    %c0_i32_1 = arith.constant 0 : i32
    return %arg0, %c0_i32, %c0_i32_0 : i32, i32, i32
  }
}

</mosaic_0001>

<bundles_post_ra>
// kernel: tpu_custom_call.1
= control target key start
LH: loop header
LB: loop body
LE: loop exit
PB: predicated region body
PF: predicated region fallthrough
CT: control target
= control target key end

     0   :  { %10 = vsyncpa [#allocation4], 0  ;;  %s1188_s0 = inlined_call_operand.hbm [shape: bf16[1,36,64], index: 0, kind: input, shape index: {}]   ;;  %s1189_s1 = inlined_call_operand.hbm [shape: bf16[192,128], index: 1, kind: input, shape index: {}]   ;;  %s1190_s2 = inlined_call_operand.vmem [shape: f32[1,128], index: 2, kind: input, shape index: {}]   ;;  %s1191_s3 = inlined_call_operand.hbm [shape: bf16[1,37,128], index: 3, kind: output, shape index: {0}]   ;;  %s1192_s4 = inlined_call_operand.hbm [shape: f32[1,2,128], index: 4, kind: output, shape index: {1}]  }
   0x1   :  { %11 = vsyncpa [#allocation7], 0 }
   0x2   :  { %12 = vsyncpa [#allocation5], 0 }
   0x3   :  { %13 = vsyncpa [#allocation10], 0  ;;  %s18_s17 = sshll.u32 %s1188_s0, 4  ;;  %s897_s18 = smov [#allocation3]   ;;  %s19_s17 = int_to_ptr.hbm [resolvable:$true] %s18_s17 }
   0x4   :  { %s20_s19 = sshll.u32 %s897_s18, 4  ;;  %s31_s22 = sshll.u32 %s1189_s1, 4  ;;  %s21_s19 = int_to_ptr.vmem [resolvable:$true] %s20_s19  ;;  %s32_s22 = int_to_ptr.hbm [resolvable:$true] %s31_s22 }
   0x5   :  { %s898_s23 = smov 64   ;;  %s899_s24 = smov 4  }
   0x6   :  { %26 = dma.hbm_to_vmem [thread:$0]  %s19_s17, 320, %s21_s19, [#allocation4], %s898_s23, %s898_s23, %s899_s24  }
   0x7   :  { %s900_s25 = smov [#allocation6]  }
   0x8   :  { %s33_s26 = sshll.u32 %s900_s25, 4  ;;  %s34_s26 = int_to_ptr.vmem [resolvable:$true] %s33_s26 }
   0x9   :  { %39 = dma.hbm_to_vmem [thread:$0]  %s32_s22, 1536, %s34_s26, [#allocation7], %s898_s23, %s898_s23, %s899_s24  }
   0xa   :  { %889 = dma.done.wait [#allocation4], 320  }
   0xb   :  { %890 = vsyncadd [#allocation4], 4294966976 }
   0xc   :  { %891 = dma.done.wait [#allocation7], 1536  }
   0xd   :  { %892 = vsyncadd [#allocation7], 4294965760  ;;  %vm56_vm0 = vcmask 519168   ;;  %vm63_vm1 = vsmask.f32 3328  ;;  %vm142_vm3 = vcmask 1042432  }
   0xe   :  { %vm64_vm2 = vsmask.f32 7440  ;;  %vm143_vm4 = vcmask 1046532   ;;  %v53_v0 = vld [vmem:[#allocation3 + $0x8] sm:$0xf]  ;;  %v768_v24 = vld [vmem:[#allocation6 + $0x38] sm:$0xff] }
   0xf   :  { %v54_v1 = vld [vmem:[#allocation3 + $0xc] sm:$0xf]  ;;  %v51_v2 = vld [vmem:[#allocation3] sm:$0xf]  ;;  %v86_v3 = vshll.u32 %v53_v0, 16  ;;  %v90_v4 = vshrl.u32 %v53_v0, 16  ;;  %vm942_vm5 = vmor %vm142_vm3, %vm143_vm4  ;;  %308 = vmatpush.bf16.msra.mxu0 %v768_v24  ;;  %773 = vmatpush.bf16.msra.mxu2 %v768_v24  ;;  %v354_v24 = vlaneseq }
  0x10   :  { %v96_v5 = vshll.u32 %v54_v1, 16  ;;  %v150_v6 = vrot.slane %v53_v0, 5  ;;  %59 = vst.msk [vmem:[#allocation2 + $0x10] sm:$0xf] %vm56_vm0, %v53_v0  ;;  %v153_v8 = vrot.slane %v54_v1, 5  ;;  %v67_v10 = vshrl.u32 %v51_v2, 16  ;;  %vm958_vm6 = vmor %vm63_vm1, %vm64_vm2 }
  0x11   :  { %60 = vst.msk [vmem:[#allocation2 + $0x18] sm:$0xf] %vm56_vm0, %v54_v1  ;;  %v52_v9 = vld [vmem:[#allocation3 + $0x4] sm:$0xf]  ;;  %v947_v11 = vrot.slane %v86_v3, 5  ;;  %v92_v12 = vrot.slane %v90_v4, 4 }
  0x12   :  { %v98_v13 = vrot.slane %v96_v5, 5  ;;  %v152_v14 = vrot.slane %v150_v6, 4  ;;  %57 = vst.msk [vmem:[#allocation2] sm:$0xf] %vm56_vm0, %v51_v2  ;;  %v155_v15 = vrot.slane %v153_v8, 4  ;;  %v69_v16 = vrot.slane %v67_v10, 4 }
  0x13   :  { %v70_v17 = vshll.u32 %v51_v2, 16  ;;  %v76_v18 = vshll.u32 %v52_v9, 16  ;;  %58 = vst.msk [vmem:[#allocation2 + $0x8] sm:$0xf] %vm56_vm0, %v52_v9  ;;  %v93_v19 = vor.u32 %v92_v12, %v947_v11  ;;  %v689_v21 = vrot.slane %v51_v2, 9  ;;  %v767_v33 = vld [vmem:[#allocation6 + $0x30] sm:$0xff] }
  0x14   :  { %v154_v20 = vsel %vm942_vm5, %v152_v14, %v153_v8  ;;  %v147_v22 = vrot.slane %v52_v9, 5  ;;  %v954_v23 = vld [vmem:[#allocation3 + $0x10] sm:$0x3]  ;;  %v100_v27 = vshrl.u32 %v54_v1, 16  ;;  %v80_v38 = vshrl.u32 %v52_v9, 16  ;;  %v771_v42 = vld [vmem:[#allocation6 + $0x50] sm:$0xff]  ;;  %309 = vmatpush.bf16.msra.mxu0 %v767_v33  ;;  %774 = vmatpush.bf16.msra.mxu2 %v767_v33 }
  0x15   :  { %166 = vst.msk [vmem:[#allocation2 + $0x14] sm:$0xf] %vm56_vm0, %v154_v20  ;;  %v72_v26 = vrot.slane %v70_v17, 5  ;;  %v106_v28 = vshll.u32 %v954_v23, 16  ;;  %v94_v29 = vrot.slane %v93_v19, 4  ;;  %v156_v32 = vrot.slane %v954_v23, 5 }
  0x16   :  { %v148_v30 = vsel %vm942_vm5, %v689_v21, %v147_v22  ;;  %v149_v31 = vrot.slane %v147_v22, 4  ;;  %v772_v34 = vld [vmem:[#allocation6 + $0x58] sm:$0xff]  ;;  %v78_v36 = vrot.slane %v76_v18, 5  ;;  %v102_v37 = vrot.slane %v100_v27, 4  ;;  %v766_v48 = vld [vmem:[#allocation6 + $0x28] sm:$0xff]  ;;  %v765_v56 = vld [vmem:[#allocation6 + $0x20] sm:$0xff] }
  0x17   :  { %v73_v35 = vor.u32 %v72_v26, %v69_v16  ;;  %164 = vst.msk [vmem:[#allocation2 + $0x4] sm:$0xf] %vm56_vm0, %v148_v30  ;;  %v99_v39 = vsel %vm958_vm6, %v94_v29, %v98_v13  ;;  %v157_v41 = vsel %vm942_vm5, %v155_v15, %v156_v32  ;;  %781 = vmatpush.bf16.msra.mxu3 %v772_v34  ;;  %v82_v45 = vrot.slane %v80_v38, 4  ;;  %v764_v59 = vld [vmem:[#allocation6 + $0x18] sm:$0xff]  ;;  %v770_v60 = vld [vmem:[#allocation6 + $0x48] sm:$0xff]  ;;  %v763_v61 = vld [vmem:[#allocation6 + $0x10] sm:$0xff] }
  0x18   :  { %v151_v40 = vsel %vm942_vm5, %v149_v31, %v150_v6  ;;  %335 = vmatpush.bf16.msra.mxu1 %v772_v34  ;;  %119 = vrot.lane.b32.xlu0 %v99_v39, %s898_s23  ;;  %v103_v44 = vor.u32 %v102_v37, %v98_v13  ;;  %v110_v46 = vshrl.u32 %v954_v23, 16  ;;  %v108_v47 = vrot.slane %v106_v28, 5  ;;  %167 = vst.msk [vmem:[#allocation2 + $0x1c] sm:$0xf] %vm56_vm0, %v157_v41  ;;  %v769_v62 = vld [vmem:[#allocation6 + $0x40] sm:$0xff]  ;;  %v762_v3 = vld [vmem:[#allocation6 + $0x8] sm:$0xff] }
  0x19   :  { %v74_v43 = vrot.slane %v73_v35, 4  ;;  %165 = vst.msk [vmem:[#allocation2 + $0xc] sm:$0xf] %vm56_vm0, %v151_v40  ;;  %v83_v51 = vor.u32 %v82_v45, %v78_v36  ;;  %310 = vmatpush.bf16.msra.mxu0 %v766_v48  ;;  %775 = vmatpush.bf16.msra.mxu2 %v766_v48  ;;  %v158_v63 = vrot.slane %v156_v32, 4  ;;  %vm298_vm7 = vcmask 523264   ;;  %v761_v4 = vld [vmem:[#allocation6] sm:$0xff] }
  0x1a   :  { %v104_v50 = vrot.slane %v103_v44, 4  ;;  %v112_v52 = vrot.slane %v110_v46, 4  ;;  %vm61_vm8 = vcmask 516096   ;;  %vm135_vm9 = vcmask 1040896   ;;  %s659_s30 = sshll.u32 %s1191_s3, 4  ;;  %s903_s5 = smov [#allocation9]   ;;  %s660_s30 = int_to_ptr.hbm [resolvable:$true] %s659_s30 }
  0x1b   :  { %v79_v49 = vsel %vm958_vm6, %v74_v43, %v78_v36  ;;  %782 = vmatpush.bf16.msra.mxu3 %v771_v42  ;;  %v84_v53 = vrot.slane %v83_v51, 4  ;;  %168 = vst.msk [vmem:[#allocation2 + $0x24] sm:$0x1] %vm61_vm8, %v158_v63  ;;  %vm130_vm10 = vcmask 1043968   ;;  %v993_v25 = vshrl.u32 %v354_v24, 7  ;;  %s671_s6 = sshll.u32 %s903_s5, 4  ;;  %s672_s6 = int_to_ptr.vmem [resolvable:$true] %s671_s6 }
  0x1c   :  { %115 = vrot.lane.b32.xlu1 %v79_v49, %s898_s23  ;;  %v113_v54 = vor.u32 %v112_v52, %v108_v47  ;;  %336 = vmatpush.bf16.msra.mxu1 %v771_v42  ;;  %v109_v55 = vsel %vm958_vm6, %v104_v50, %v108_v47  ;;  %v759_v0 = vld [vmem:[#allocation2 + $0x14] sm:$0xf]  ;;  %62 = vst.msk [vmem:[#allocation2 + $0x20] sm:$0x1] %vm61_vm8, %v954_v23  ;;  %v901_v52 = vmov 0   ;;  %s673_s9 = sshll.u32 %s1192_s4, 4  ;;  %s674_s9 = int_to_ptr.hbm [resolvable:$true] %s673_s9 }
  0x1d   :  { %v89_v58 = vsel %vm958_vm6, %v84_v53, %v947_v11  ;;  %311 = vmatpush.bf16.msra.mxu0 %v765_v56  ;;  %776 = vmatpush.bf16.msra.mxu2 %v765_v56  ;;  %v363_v26 = vand.u32 65535, %v993_v25  ;;  %v997_v27 = vadd.s32 16, %v993_v25  ;;  %v1000_v28 = vadd.s32 8, %v993_v25 }
  0x1e   :  { %v114_v57 = vrot.slane %v113_v54, 4  ;;  %v757_v6 = vld [vmem:[#allocation2 + $0x4] sm:$0xf]  ;;  %v364_v29 = vshrl.u32 %v993_v25, 16  ;;  %v1018_v41 = vadd.s32 24, %v993_v25 }
  0x1f   :  { %783 = vmatpush.bf16.msra.mxu3 %v770_v60  ;;  %v702_v1 = vld [vmem:[#allocation2 + $0x18] sm:$0xf0]  ;;  %v1003_v30 = vmul.u32 58254, %v363_v26  ;;  %v392_v31 = vand.u32 65535, %v1000_v28  ;;  %v421_v32 = vand.u32 65535, %v997_v27  ;;  %v366_v33 = vmul.u32 14564, %v363_v26 }
  0x20   :  { %121 = vrot.lane.b32.xlu0 %v109_v55, %s898_s23  ;;  %123 = vrot.lane.b32.xlu2 %v114_v57, %s898_s23  ;;  %v705_v2 = vor.u32 %v759_v0, %v702_v1  ;;  %v694_v7 = vld [vmem:[#allocation2 + $0x8] sm:$0xf0]  ;;  %v1007_v34 = vmul.u32 14564, %v364_v29  ;;  %v393_v36 = vshrl.u32 %v1000_v28, 16  ;;  %v422_v38 = vshrl.u32 %v997_v27, 16 }
  0x21   :  { %312 = vmatpush.bf16.msra.mxu0 %v764_v59  ;;  %777 = vmatpush.bf16.msra.mxu2 %v764_v59  ;;  %v697_v8 = vor.u32 %v757_v6, %v694_v7  ;;  %v370_v35 = vshll.u32 %v1003_v30, 16  ;;  %v1011_v37 = vmul.u32 58254, %v392_v31  ;;  %v1014_v39 = vmul.u32 58254, %v421_v32 }
  0x22   :  { %337 = vmatpush.bf16.msra.mxu1 %v770_v60  ;;  %v372_v40 = vshll.u32 %v1007_v34, 16  ;;  %v395_v43 = vmul.u32 14564, %v392_v31  ;;  %v1020_v44 = vmul.u32 14564, %v393_v36  ;;  %v1023_v46 = vmul.u32 14564, %v422_v38 }
  0x23   :  { %784 = vmatpush.bf16.msra.mxu3 %v769_v62  ;;  %vm374_vm11 = vc.u32 %v366_v33, %v370_v35  ;;  %v376_v42 = vadd.s32 %v370_v35, %v366_v33  ;;  %v399_v45 = vshll.u32 %v1011_v37, 16  ;;  %v450_v47 = vand.u32 65535, %v1018_v41 }
  0x24   :  { %117 = vrot.lane.b32.xlu1 %v89_v58, %s898_s23  ;;  %v424_v48 = vmul.u32 14564, %v421_v32  ;;  %v428_v49 = vshll.u32 %v1014_v39, 16  ;;  %v369_v51 = vmul.u32 58254, %v364_v29  ;;  %v375_v53 = vsel %vm374_vm11, 1, %v901_v52 }
  0x25   :  { %313 = vmatpush.bf16.msra.mxu0 %v763_v61  ;;  %778 = vmatpush.bf16.msra.mxu2 %v763_v61  ;;  %v451_v54 = vshrl.u32 %v1018_v41, 16  ;;  %vm1031_vm12 = vc.u32 %v376_v42, %v372_v40  ;;  %v401_v56 = vshll.u32 %v1020_v44, 16  ;;  %vm403_vm13 = vc.u32 %v395_v43, %v399_v45 }
  0x26   :  { %338 = vmatpush.bf16.msra.mxu1 %v769_v62  ;;  %755 = vmatmul.msk.bf16.vlgmr.msra.gmra.mxu3 %vm298_vm7, %v705_v2  ;;  %v405_v57 = vadd.s32 %v399_v45, %v395_v43  ;;  %v430_v58 = vshll.u32 %v1023_v46, 16  ;;  %v453_v59 = vmul.u32 14564, %v450_v47  ;;  %v454_v60 = vmul.u32 58254, %v450_v47 }
  0x27   :  { %v1037_v61 = vmul.u32 14564, %v451_v54  ;;  %vm432_vm14 = vc.u32 %v424_v48, %v428_v49  ;;  %v434_v62 = vadd.s32 %v428_v49, %v424_v48  ;;  %v398_v63 = vmul.u32 58254, %v393_v36 }
  0x28   :  { %v1040_v0 = vadd.s32 32, %v993_v25  ;;  %v404_v1 = vsel %vm403_vm13, 1, %v901_v52  ;;  %v457_v2 = vshll.u32 %v454_v60, 16  ;;  %vm407_vm15 = vc.u32 %v405_v57, %v401_v56 }
  0x29   :  { %314 = vmatpush.bf16.msra.mxu0 %v762_v3  ;;  %779 = vmatpush.bf16.msra.mxu2 %v762_v3  ;;  %v377_v3 = vadd.s32 %v375_v53, %v369_v51  ;;  %v379_v6 = vsel %vm1031_vm12, 1, %v901_v52  ;;  %v433_v7 = vsel %vm432_vm14, 1, %v901_v52  ;;  %vm436_vm1 = vc.u32 %v434_v62, %v430_v58 }
  0x2a   :  { %754 = vmatmul.msk.bf16.vlgmr.msra.gmra.mxu1 %vm298_vm7, %v697_v8  ;;  %v459_v8 = vshll.u32 %v1037_v61, 16  ;;  %vm461_vm0 = vc.u32 %v453_v59, %v457_v2  ;;  %v429_v32 = vshrl.u32 %v1014_v39, 16  ;;  %v373_v36 = vshrl.u32 %v1007_v34, 16 }
  0x2b   :  { %v458_v45 = vshrl.u32 %v454_v60, 16  ;;  %v431_v49 = vshrl.u32 %v1023_v46, 16  ;;  %vm627_vm13 = vcmask 1043456  }
  0x2d   :  { %315 = vmatpush.bf16.msra.mxu0 %v761_v4  ;;  %780 = vmatpush.bf16.msra.mxu2 %v761_v4  ;;  %v427_v4 = vmul.u32 58254, %v422_v38  ;;  %v402_v38 = vshrl.u32 %v1020_v44, 16  ;;  %v460_v44 = vshrl.u32 %v1037_v61, 16  ;;  %v1070_v61 = vld [vmem:[%s1190_s2] ss:$0 sm:$0xff]  ;;  %s902_s2 = smov [#allocation8]  }
  0x2e   :  { %s657_s27 = sshll.u32 %s902_s2, 4  ;;  %s658_s27 = int_to_ptr.vmem [resolvable:$true] %s657_s27 }
  0x7a   :  { %v124_v5 = vpop.permute.xlu2 %123 }
  0x7b   :  { %136 = vst.msk [vmem:[#allocation2 + $0x20] sm:$0x1] %vm135_vm9, %v124_v5  ;;  %v479_v5 = vand.u32 65535, %v1040_v0 }
  0x82   :  { %v173_v9 = vld [vmem:[#allocation2 + $0x20] sm:$0x11] }
  0x83   :  { %v216_v10 = vunpack.c.h.b16 %v173_v9  ;;  %v215_v22 = vunpack.c.l.b16 %v173_v9  ;;  %v406_v9 = vadd.s32 %v404_v1, %v398_v63 }
  0x85   :  { %v222_v11 = vpack.c.b16 %v216_v10, %v216_v10  ;;  %v221_v23 = vpack.c.b16 %v215_v22, %v215_v22  ;;  %v463_v10 = vadd.s32 %v457_v2, %v453_v59  ;;  %v400_v22 = vshrl.u32 %v1011_v37, 16 }
  0x87   :  { %756 = vmatmul.msk.bf16.gmra.mxu3 %vm298_vm7, %v222_v11  ;;  %v480_v11 = vshrl.u32 %v1040_v0, 16  ;;  %vm465_vm2 = vc.u32 %v463_v10, %v459_v8 }
  0x88   :  { %v466_v35 = vsel %vm465_vm2, 1, %v901_v52 }
  0x89   :  { %v484_v24 = vmul.u32 14564, %v480_v11  ;;  %v485_v31 = vmul.u32 58254, %v480_v11 }
  0x8a   :  { %v120_v12 = vpop.permute.xlu0 %119 }
  0x8b   :  { %133 = vst.msk [vmem:[#allocation2 + $0x10] sm:$0xf] %vm130_vm10, %v120_v12  ;;  %v488_v42 = vshll.u32 %v484_v24, 16  ;;  %v489_v63 = vshrl.u32 %v484_v24, 16 }
  0x8e   :  { %v116_v13 = vpop.permute.xlu1 %115 }
  0x8f   :  { %131 = vst.msk [vmem:[#allocation2] sm:$0xf] %vm130_vm10, %v116_v13  ;;  %v408_v13 = vsel %vm407_vm15, 1, %v901_v52 }
  0x92   :  { %v122_v14 = vpop.permute.xlu0 %121  ;;  %v700_v16 = vld [vmem:[#allocation2 + $0x10] sm:$0xf] }
  0x93   :  { %134 = vst.msk [vmem:[#allocation2 + $0x18] sm:$0xf] %vm130_vm10, %v122_v14  ;;  %v456_v14 = vmul.u32 58254, %v451_v54 }
  0x96   :  { %v118_v15 = vpop.permute.xlu1 %117  ;;  %v692_v18 = vld [vmem:[#allocation2] sm:$0xf] }
  0x97   :  { %132 = vst.msk [vmem:[#allocation2 + $0x8] sm:$0xf] %vm130_vm10, %v118_v15  ;;  %v435_v15 = vadd.s32 %v433_v7, %v427_v4 }
  0x9a   :  { %v760_v17 = vld [vmem:[#allocation2 + $0x14] sm:$0xf0] }
  0x9b   :  { %v701_v19 = vor.u32 %v760_v17, %v700_v16  ;;  %v462_v16 = vsel %vm461_vm0, 1, %v901_v52  ;;  %v482_v17 = vmul.u32 14564, %v479_v5 }
  0x9c   :  { %v464_v29 = vadd.s32 %v462_v16, %v456_v14 }
  0x9d   :  { %321 = vmatmul.bf16.vlgmr.msra.gmra.mxu2 %v701_v19  ;;  %v371_v19 = vshrl.u32 %v1003_v30, 16 }
  0x9e   :  { %v758_v20 = vld [vmem:[#allocation2 + $0x4] sm:$0xf0]  ;;  %v468_v47 = vadd.s32 %v466_v35, %v464_v29 }
  0x9f   :  { %v693_v21 = vor.u32 %v758_v20, %v692_v18  ;;  %v483_v18 = vmul.u32 58254, %v479_v5  ;;  %v381_v20 = vadd.s32 %v379_v6, %v377_v3 }
  0xa0   :  { %v469_v55 = vadd.s32 %v468_v47, %v458_v45 }
  0xa1   :  { %316 = vmatmul.bf16.vlgmr.msra.gmra.mxu0 %v693_v21  ;;  %v437_v21 = vsel %vm436_vm1, 1, %v901_v52  ;;  %v486_v26 = vshll.u32 %v483_v18, 16  ;;  %v382_v30 = vadd.s32 %v381_v20, %v371_v19  ;;  %v487_v56 = vshrl.u32 %v483_v18, 16 }
  0xa2   :  { %v439_v33 = vadd.s32 %v437_v21, %v435_v15  ;;  %v470_v62 = vadd.s32 %v469_v55, %v460_v44  ;;  %vm628_vm1 = vsmask.f32 7938 }
  0xa3   :  { %vm490_vm3 = vc.u32 %v482_v17, %v486_v26  ;;  %v492_v43 = vadd.s32 %v486_v26, %v482_v17  ;;  %v383_v34 = vadd.s32 %v382_v30, %v373_v36 }
  0xa4   :  { %v491_v37 = vsel %vm490_vm3, 1, %v901_v52  ;;  %v440_v39 = vadd.s32 %v439_v33, %v429_v32  ;;  %v471_v5 = vshrl.u32 %v470_v62, 4  ;;  %vm1107_vm3 = vmand %vm627_vm13, %vm628_vm1 }
  0xa5   :  { %v493_v48 = vadd.s32 %v491_v37, %v485_v31  ;;  %vm494_vm4 = vc.u32 %v492_v43, %v488_v42  ;;  %v384_v60 = vshrl.u32 %v383_v34, 4  ;;  %v630_v43 = vld [vmem:[#allocation8] sm:$0xf] }
  0xa6   :  { %v495_v53 = vsel %vm494_vm4, 1, %v901_v52  ;;  %v441_v58 = vadd.s32 %v440_v39, %v431_v49  ;;  %v472_v10 = vmul.u32 18, %v471_v5 }
  0xa7   :  { %v497_v57 = vadd.s32 %v495_v53, %v493_v48  ;;  %v385_v4 = vmul.u32 18, %v384_v60  ;;  %v340_v8 = vpop.f32.mrf.mxu1 }
  0xa8   :  { %v442_v46 = vshrl.u32 %v441_v58, 4  ;;  %v473_v16 = vsub.s32 %v1018_v41, %v472_v10 }
  0xa9   :  { %v1027_v50 = vpop.f32.mrf.mxu3  ;;  %v498_v1 = vadd.s32 %v497_v57, %v487_v56 }
  0xaa   :  { %v443_v52 = vmul.u32 18, %v442_v46  ;;  %vm508_vm15 = vcmp.ne.s32.totalorder %v473_v16, 0  ;;  %vm513_vm0 = vcmp.lt.s32.totalorder %v473_v16, 0  ;;  %v523_v30 = vadd.s32 18, %v473_v16 }
  0xab   :  { %v499_v6 = vadd.s32 %v498_v1, %v489_v63  ;;  %vm1102_vm2 = vmand %vm513_vm0, %vm508_vm15 }
  0xad   :  { %326 = vmatmul.bf16.gmra.mxu2 %v221_v23  ;;  %v410_v23 = vadd.s32 %v408_v13, %v406_v9  ;;  %v386_v9 = vsub.s32 %v993_v25, %v385_v4  ;;  %v500_v11 = vshrl.u32 %v499_v6, 4  ;;  %v444_v13 = vsub.s32 %v997_v27, %v443_v52 }
  0xaf   :  { %v411_v40 = vadd.s32 %v410_v23, %v400_v22  ;;  %vm505_vm7 = vcmp.ne.s32.totalorder %v386_v9, 0  ;;  %vm510_vm8 = vcmp.lt.s32.totalorder %v386_v9, 0  ;;  %v501_v17 = vmul.u32 18, %v500_v11  ;;  %v342_v36 = vpop.f32.mrf.mxu1 }
  0xb0   :  { %vm507_vm9 = vcmp.ne.s32.totalorder %v444_v13, 0  ;;  %vm512_vm10 = vcmp.lt.s32.totalorder %v444_v13, 0  ;;  %v520_v25 = vadd.s32 18, %v386_v9  ;;  %vm1082_vm12 = vmand %vm510_vm8, %vm505_vm7  ;;  %v522_v41 = vadd.s32 18, %v444_v13 }
  0xb1   :  { %v1050_v12 = vpop.f32.mrf.mxu3  ;;  %v412_v54 = vadd.s32 %v411_v40, %v402_v38  ;;  %vm1087_vm14 = vmand %vm512_vm10, %vm507_vm9  ;;  %v1092_v26 = vsub.s32 %v1040_v0, %v501_v17  ;;  %vm576_vm9 = vsmask.f32 256 }
  0xb2   :  { %v525_v33 = vsel %vm1082_vm12, %v520_v25, %v386_v9  ;;  %v527_v40 = vsel %vm1087_vm14, %v522_v41, %v444_v13  ;;  %vm577_vm12 = vsmask.f32 4368  ;;  %vm543_vm14 = vcmask 1041408  }
  0xb3   :  { %v413_v59 = vshrl.u32 %v412_v54, 4  ;;  %vm1113_vm7 = vcmp.lt.s32.totalorder %v525_v33, 16  ;;  %vm1117_vm8 = vcmp.lt.s32.totalorder %v527_v40, 16  ;;  %v528_v54 = vsel %vm1102_vm2, %v523_v30, %v473_v16  ;;  %vm1145_vm15 = vmor %vm576_vm9, %vm577_vm12 }
  0xb4   :  { %v524_v44 = vadd.s32 18, %v1092_v26  ;;  %vm1134_vm13 = vcmp.lt.s32.totalorder %v528_v54, 16  ;;  %vm637_vm2 = vsmask.f32 1280  ;;  %v639_v54 = vld [vmem:[#allocation8 + $0x10] sm:$0x3] }
  0xb5   :  { %v414_v3 = vmul.u32 18, %v413_v59 }
  0xb7   :  { %v415_v7 = vsub.s32 %v1000_v28, %v414_v3 }
  0xb9   :  { %vm506_vm5 = vcmp.ne.s32.totalorder %v415_v7, 0  ;;  %vm511_vm6 = vcmp.lt.s32.totalorder %v415_v7, 0  ;;  %v521_v28 = vadd.s32 18, %v415_v7 }
  0xba   :  { %vm1078_vm11 = vmand %vm511_vm6, %vm506_vm5  ;;  %vm509_vm5 = vcmp.ne.s32.totalorder %v1092_v26, 0  ;;  %vm514_vm6 = vcmp.lt.s32.totalorder %v1092_v26, 0 }
  0xbb   :  { %v526_v32 = vsel %vm1078_vm11, %v521_v28, %v415_v7  ;;  %vm1127_vm10 = vmand %vm514_vm6, %vm509_vm5  ;;  %vm568_vm11 = vcmask 1040384   ;;  %vm648_vm5 = vsmask.f32 2310 }
  0xbc   :  { %vm531_vm4 = vcmp.lt.s32.totalorder %v526_v32, 16  ;;  %v529_v3 = vsel %vm1127_vm10, %v524_v44, %v1092_v26  ;;  %vm1151_vm0 = vmand %vm568_vm11, %vm576_vm9 }
  0xbd   :  { %vm1158_vm1 = vcmp.lt.s32.totalorder %v529_v3, 16 }
 0x10a   :  { %v1063_v51 = vpop.f32.mrf.mxu3 }
 0x112   :  { %v352_v2 = vpop.f32.mrf.mxu3 }
 0x11e   :  { %v317_v14 = vpop.f32.mrf.mxu0 }
 0x11f   :  { %v318_v15 = vadd.f32 %v1070_v61, %v317_v14 }
 0x120   :  { %v322_v19 = vpop.f32.mrf.mxu2 }
 0x121   :  { %v341_v18 = vadd.f32 %v340_v8, %v318_v15  ;;  %v323_v20 = vadd.f32 %v1070_v61, %v322_v19 }
 0x123   :  { %v571_v22 = vpack.c.bf16 %v341_v18, %v341_v18  ;;  %v346_v23 = vadd.f32 %v1027_v50, %v323_v20  ;;  %v535_v60 = vsel %vm1113_vm7, %v341_v18, 0.0 }
 0x124   :  { %v552_v7 = vmul.f32 %v535_v60, %v535_v60 }
 0x125   :  { %v580_v29 = vshrl.u32 %v571_v22, 16  ;;  %v583_v31 = vshll.u32 %v571_v22, 16  ;;  %v573_v35 = vpack.c.bf16 %v346_v23, %v346_v23  ;;  %v537_v4 = vsel %vm1117_vm8, %v346_v23, 0.0 }
 0x126   :  { %v319_v50 = vpop.f32.mrf.mxu0  ;;  %v554_v18 = vmul.f32 %v537_v4, %v537_v4 }
 0x127   :  { %v582_v38 = vrot.slane %v580_v29, 7  ;;  %v320_v0 = vadd.f32 %v1070_v61, %v319_v50  ;;  %v597_v45 = vshrl.u32 %v573_v35, 16  ;;  %v600_v46 = vshll.u32 %v573_v35, 16 }
 0x128   :  { %v324_v39 = vpop.f32.mrf.mxu2 }
 0x129   :  { %v585_v48 = vor.u32 %v583_v31, %v582_v38  ;;  %v343_v49 = vadd.f32 %v342_v36, %v320_v0  ;;  %v325_v34 = vadd.f32 %v1070_v61, %v324_v39  ;;  %v599_v59 = vrot.slane %v597_v45, 7 }
 0x12a   :  { %v586_v8 = vrot.slane %v582_v38, 4 }
 0x12b   :  { %v631_v55 = vsel %vm1107_vm3, %v585_v48, %v630_v43  ;;  %v536_v56 = vsel %vm531_vm4, %v343_v49, 0.0  ;;  %v572_v57 = vpack.c.bf16 %v343_v49, %v343_v49  ;;  %v348_v63 = vadd.f32 %v1050_v12, %v325_v34  ;;  %vm638_vm3 = vmand %vm543_vm14, %vm637_vm2 }
 0x12c   :  { %632 = vst [vmem:[#allocation8] sm:$0xf] %v631_v55  ;;  %v553_v2 = vmul.f32 %v536_v56, %v536_v56  ;;  %v602_v12 = vor.u32 %v600_v46, %v599_v59  ;;  %v540_v9 = vadd.f32 %v536_v56, %v535_v60  ;;  %v604_v29 = vrot.slane %v599_v59, 4 }
 0x12d   :  { %v588_v62 = vshrl.u32 %v572_v57, 16  ;;  %v591_v6 = vshll.u32 %v572_v57, 16  ;;  %v574_v52 = vpack.c.bf16 %v348_v63, %v348_v63  ;;  %v538_v15 = vsel %vm1134_vm13, %v348_v63, 0.0 }
 0x12e   :  { %v557_v19 = vadd.f32 %v553_v2, %v552_v7  ;;  %v541_v23 = vadd.f32 %v540_v9, %v537_v4  ;;  %v555_v26 = vmul.f32 %v538_v15, %v538_v15  ;;  %vm647_vm4 = vcmask 1042433  }
 0x12f   :  { %v590_v5 = vrot.slane %v588_v62, 7  ;;  %v606_v16 = vshrl.u32 %v574_v52, 16  ;;  %v609_v41 = vshll.u32 %v574_v52, 16  ;;  %vm649_vm6 = vmand %vm647_vm4, %vm648_vm5 }
 0x130   :  { %v327_v17 = vpop.f32.mrf.mxu2  ;;  %v558_v32 = vadd.f32 %v557_v19, %v554_v18  ;;  %v542_v33 = vadd.f32 %v541_v23, %v538_v15 }
 0x131   :  { %v593_v11 = vor.u32 %v591_v6, %v590_v5  ;;  %v595_v13 = vrot.slane %v590_v5, 4  ;;  %v328_v28 = vadd.f32 %v1070_v61, %v327_v17  ;;  %v608_v22 = vrot.slane %v606_v16, 7 }
 0x132   :  { %v559_v40 = vadd.f32 %v558_v32, %v555_v26 }
 0x133   :  { %v594_v20 = vsel %vm1145_vm15, %v586_v8, %v593_v11  ;;  %v603_v27 = vsel %vm1145_vm15, %v595_v13, %v602_v12  ;;  %v644_v21 = vld [vmem:[#allocation8] sm:$0x1]  ;;  %v351_v61 = vadd.f32 %v1063_v51, %v328_v28  ;;  %v611_v31 = vor.u32 %v609_v41, %v608_v22 }
 0x134   :  { %633 = vst [vmem:[#allocation8 + $0x4] sm:$0xf] %v594_v20  ;;  %v645_v24 = vsel %vm1151_vm0, 0, %v644_v21  ;;  %v613_v49 = vrot.slane %v608_v22, 4 }
 0x135   :  { %634 = vst [vmem:[#allocation8 + $0x8] sm:$0xf] %v603_v27  ;;  %v539_v35 = vsel %vm1158_vm1, %v351_v61, 0.0  ;;  %v575_v50 = vpack.c.bf16 %v351_v61, %v351_v61  ;;  %v612_v36 = vsel %vm1145_vm15, %v604_v29, %v611_v31 }
 0x136   :  { %646 = vst [vmem:[#allocation8] sm:$0x1] %v645_v24  ;;  %v544_v30 = vsel %vm543_vm14, %v539_v35, 0.0  ;;  %v556_v38 = vmul.f32 %v539_v35, %v539_v35 }
 0x137   :  { %635 = vst [vmem:[#allocation8 + $0xc] sm:$0xf] %v612_v36  ;;  %v545_v0 = vadd.f32 %v544_v30, %v542_v33  ;;  %v615_v51 = vshrl.u32 %v575_v50, 16  ;;  %v618_v48 = vshll.u32 %v575_v50, 16 }
 0x138   :  { %v560_v42 = vsel %vm543_vm14, %v556_v38, 0.0  ;;  %v329_v37 = vpop.f32.mrf.mxu2 }
 0x139   :  { %v546_v43 = vrot.slane %v545_v0, 4  ;;  %v561_v45 = vadd.f32 %v560_v42, %v559_v40  ;;  %v617_v47 = vrot.slane %v615_v51, 7 }
 0x13b   :  { %v547_v39 = vadd.f32 %v546_v43, %v545_v0  ;;  %v562_v53 = vrot.slane %v561_v45, 4  ;;  %v620_v34 = vor.u32 %v618_v48, %v617_v47 }
 0x13d   :  { %v548_v44 = vrot.slane %v547_v39, 2  ;;  %v563_v55 = vadd.f32 %v562_v53, %v561_v45  ;;  %v621_v56 = vsel %vm1145_vm15, %v613_v49, %v620_v34 }
 0x13e   :  { %v640_v57 = vsel %vm638_vm3, %v621_v56, %v639_v54 }
 0x13f   :  { %v549_v58 = vadd.f32 %v548_v44, %v547_v39  ;;  %v564_v59 = vrot.slane %v563_v55, 2  ;;  %641 = vst [vmem:[#allocation8 + $0x10] sm:$0x3] %v640_v57 }
 0x141   :  { %v550_v60 = vrot.slane %v549_v58, 1  ;;  %v565_v62 = vadd.f32 %v564_v59, %v563_v55 }
 0x143   :  { %v566_v63 = vrot.slane %v565_v62, 1  ;;  %v551_v1 = vadd.f32 %v550_v60, %v549_v58 }
 0x145   :  { %v567_v46 = vadd.f32 %v566_v63, %v565_v62 }
 0x146   :  { %v650_v2 = vld [vmem:[#allocation8 + $0x10] sm:$0x6] }
 0x147   :  { %v651_v3 = vsel %vm649_vm6, 0, %v650_v2  ;;  %v569_v4 = vsel %vm568_vm11, %v551_v1, %v567_v46 }
 0x148   :  { %652 = vst [vmem:[#allocation8 + $0x10] sm:$0x6] %v651_v3 }
 0x149   :  { %665 = dma.vmem_to_hbm [thread:$0]  %s658_s27, 320, %s660_s30, [#allocation5], %s898_s23, %s898_s23, %s899_s24   ;;  %570 = vst [vmem:[#allocation9] sm:$0x3] %v569_v4 }
 0x14a   :  { %676 = dma.vmem_to_hbm [thread:$0]  %s672_s6, 32, %s674_s9, [#allocation10]  }
 0x14b   :  { %893 = dma.done.wait [#allocation5], 320  }
 0x14c   :  { %894 = vsyncadd [#allocation5], 4294966976 }
 0x14d   :  { %895 = dma.done.wait [#allocation10], 32  }
 0x14e   :  { %896 = vsyncadd [#allocation10], 4294967264 }
 0x14f   :  { %685 = vsyncpa [#allocation4], 1 }
 0x150   :  { %686 = vsyncpa [#allocation7], 1 }
 0x151   :  { %687 = vsyncpa [#allocation5], 1 }
 0x152   :  { %688 = vsyncpa [#allocation10], 1 }

</bundles_post_ra>
